<compile_context>
chip_gen: v5e
topology: v5e:2x2
jax: 0.10.0
libtpu: 0.0.40
codegen_flags: <defaults>
</compile_context>

<pallas_src>
import jax
import jax.numpy as jnp
from jax.experimental import pallas as pl
from jax.experimental.pallas import tpu as pltpu

LANE = 128  # lane width: pad hidden / input dims to multiples of this


def _round_up(v, m):
    return (v + m - 1) // m * m


# ---------------------------------------------------------------------------
# Shared per-step gate math (single fused MXU matmul, f32 gate math).
# ---------------------------------------------------------------------------
def _sigmoid(x):
    # Exact sigmoid via tanh: keeps the transcendental on the EUP slot and
    # avoids the VPU divide of 1/(1+exp(-x)).
    return 0.5 * (jnp.tanh(0.5 * x) + 1.0)


def _gru_fused_step(x_pad, h, w_ref):
    """One GRU step.

    x_pad : (B, Kp) f32 -- x in lanes [0:K), constant 1.0 in lane K (bias lane).
    h     : (B, Hp) f32 -- hidden state, padded lanes are 0.
    w_ref : (Kp+Hp, 4*Hp) ref -- fused weights, column slabs [g1 | g2 | g3x | g3h],
            biases folded into row K (the bias lane of x_pad).
    """
    hp = h.shape[-1]
    lhs = jnp.concatenate([x_pad, h], axis=-1).astype(w_ref.dtype)  # aligned concat
    g = jnp.dot(lhs, w_ref[...], preferred_element_type=jnp.float32)  # (B, 4*Hp)
    r = _sigmoid(g[:, 0 * hp:1 * hp])
    z = _sigmoid(g[:, 1 * hp:2 * hp])
    n = jnp.tanh(g[:, 2 * hp:3 * hp] + r * g[:, 3 * hp:4 * hp])
    return (1.0 - z) * n + z * h


# ---------------------------------------------------------------------------
# Kernels.
# ---------------------------------------------------------------------------
def _gru_cell_kernel(x_ref, h_ref, w_ref, out_ref):
    """Exactly MyGRUv1Cell.forward for one step."""
    h_new = _gru_fused_step(x_ref[...].astype(jnp.float32),
                            h_ref[...].astype(jnp.float32),
                            w_ref)
    out_ref[...] = h_new.astype(out_ref.dtype)


def _gru_seq_kernel(xs_ref, h0_ref, w_ref, out_ref, h_scr):
    """One grid step = one (batch-shard, time-chunk); fori_loop over TBLK steps."""
    tc = pl.program_id(1)

    @pl.when(tc == 0)
    def _():
        h_scr[...] = h0_ref[...].astype(jnp.float32)

    tblk = xs_ref.shape[0]

    def step(t, h):
        h_new = _gru_fused_step(xs_ref[t].astype(jnp.float32), h, w_ref)
        out_ref[t] = h_new.astype(out_ref.dtype)
        return h_new

    h_scr[...] = jax.lax.fori_loop(0, tblk, step, h_scr[...])


# ---------------------------------------------------------------------------
# Host-side parameter fusion: 12 tensors -> one (Kp+Hp, 4*Hp) block matrix.
# ---------------------------------------------------------------------------
def pack_params(params, input_size, hidden_size, weight_dtype=jnp.float32):
    k, h = input_size, hidden_size
    kp = _round_up(k + 1, LANE)   # +1 reserves the constant-1 bias lane
    hp = _round_up(h, LANE)

    w = jnp.zeros((kp + hp, 4 * hp), jnp.float32)
    # x block rows [0:k)
    w = w.at[:k, 0 * hp:0 * hp + h].set(params["wx1"])
    w = w.at[:k, 1 * hp:1 * hp + h].set(params["wx2"])
    w = w.at[:k, 2 * hp:2 * hp + h].set(params["wx3"])
    # bias row (multiplied by the constant-1 lane of x_pad)
    w = w.at[k, 0 * hp:0 * hp + h].set((params["bx1"] + params["bh1"])[0])
    w = w.at[k, 1 * hp:1 * hp + h].set((params["bx2"] + params["bh2"])[0])
    w = w.at[k, 2 * hp:2 * hp + h].set(params["bx3"][0])
    w = w.at[k, 3 * hp:3 * hp + h].set(params["bh3"][0])
    # h block rows [kp:kp+h)
    w = w.at[kp:kp + h, 0 * hp:0 * hp + h].set(params["wh1"])
    w = w.at[kp:kp + h, 1 * hp:1 * hp + h].set(params["wh2"])
    w = w.at[kp:kp + h, 3 * hp:3 * hp + h].set(params["wh3"])

    return dict(w=w.astype(weight_dtype), input=k, input_padded=kp,
                hidden=h, hidden_padded=hp)


def _pad_x_with_bias_lane(x, k, kp):
    """(..., K) -> (..., Kp) f32 with zeros in [K+1:Kp) and 1.0 in lane K."""
    shape = x.shape[:-1] + (kp,)
    xp = jnp.zeros(shape, jnp.float32)
    xp = xp.at[..., :k].set(x.astype(jnp.float32))
    xp = xp.at[..., k].set(1.0)
    return xp


# ---------------------------------------------------------------------------
# Wrappers.
# ---------------------------------------------------------------------------
def my_gru_v1_cell(x, state, fused):
    """x: (B, K), state: (B, H) -> hdot: (B, H). Matches MyGRUv1Cell.forward."""
    b = x.shape[0]
    k, kp = fused["input"], fused["input_padded"]
    h, hp = fused["hidden"], fused["hidden_padded"]

    x_p = _pad_x_with_bias_lane(x, k, kp)                           # (B, Kp)
    h_p = jnp.pad(state.astype(jnp.float32), ((0, 0), (0, hp - h))) # (B, Hp)

    vmem = pl.BlockSpec(memory_space=pltpu.MemorySpace.VMEM)
    out = pl.pallas_call(
        _gru_cell_kernel,
        out_shape=jax.ShapeDtypeStruct((b, hp), jnp.float32),
        in_specs=[vmem, vmem, vmem],
        out_specs=vmem,
        input_output_aliases={1: 0},  # write h_new in place of the padded state
    )(x_p, h_p, fused["w"])
    return out[:, :h].astype(state.dtype)


def my_gru_v1_sequence(xs, h0, fused, *, tblk=8, batch_shards=1):
    """xs: (T, B, K), h0: (B, H) -> all hidden states (T, B, H)."""
    t_len, b, k = xs.shape
    kp = fused["input_padded"]
    h, hp = fused["hidden"], fused["hidden_padded"]

    assert b % batch_shards == 0
    bb = b // batch_shards
    assert bb % 8 == 0 or bb == b, "per-shard batch must be a sublane multiple"

    n_tc = pl.cdiv(t_len, tblk)
    t_pad = n_tc * tblk

    xs_p = jnp.zeros((t_pad, b, kp), jnp.float32)
    xs_p = xs_p.at[:t_len, :, :k].set(xs.astype(jnp.float32))
    xs_p = xs_p.at[:, :, k].set(1.0)                                 # bias lane
    h0_p = jnp.pad(h0.astype(jnp.float32), ((0, 0), (0, hp - h)))

    out = pl.pallas_call(
        _gru_seq_kernel,
        out_shape=jax.ShapeDtypeStruct((t_pad, b, hp), jnp.float32),
        grid=(batch_shards, n_tc),
        in_specs=[
            # x streamed in (TBLK, bb, Kp) chunks
            pl.BlockSpec((tblk, bb, kp), lambda bs, tc: (tc, bs, 0)),
            # initial hidden state per batch shard (read only at tc == 0)
            pl.BlockSpec((bb, hp), lambda bs, tc: (bs, 0)),
            # fused weights: resident in VMEM, untiled, no double-buffering
            pl.BlockSpec(memory_space=pltpu.MemorySpace.VMEM),
        ],
        out_specs=pl.BlockSpec((tblk, bb, hp), lambda bs, tc: (tc, bs, 0)),
        scratch_shapes=[pltpu.VMEM((bb, hp), jnp.float32)],          # h carry
        compiler_params=pltpu.CompilerParams(
            # batch shards are independent -> parallel (megacore on v7x);
            # time chunks carry the recurrence -> arbitrary (sequential).
            dimension_semantics=("parallel", "arbitrary")),
    )(xs_p, h0_p, fused["w"])
    return out[:t_len, :, :h].astype(xs.dtype)


# ---------------------------------------------------------------------------
# Reference (pure JAX) + init.
# ---------------------------------------------------------------------------
def init_params(key, input_size, hidden_size, dtype=jnp.float32):
    keys = jax.random.split(key, 12)
    p = {}
    bx = 1.0 / jnp.sqrt(input_size)
    bh = 1.0 / jnp.sqrt(hidden_size)
    for i, name in enumerate(["x1", "x2", "x3"]):
        p[f"w{name}"] = jax.random.uniform(
            keys[2 * i], (input_size, hidden_size), dtype, -bx, bx)
        p[f"b{name}"] = jax.random.uniform(
            keys[2 * i + 1], (1, hidden_size), dtype, -bx, bx)
    for i, name in enumerate(["h1", "h2", "h3"]):
        p[f"w{name}"] = jax.random.uniform(
            keys[6 + 2 * i], (hidden_size, hidden_size), dtype, -bh, bh)
        p[f"b{name}"] = jax.random.uniform(
            keys[6 + 2 * i + 1], (1, hidden_size), dtype, -bh, bh)
    return p


def reference_gru(x, state, p):
    def lin(v, w, b):
        return v @ w + b
    r = jax.nn.sigmoid(lin(x, p["wx1"], p["bx1"]) + lin(state, p["wh1"], p["bh1"]))
    z = jax.nn.sigmoid(lin(x, p["wx2"], p["bx2"]) + lin(state, p["wh2"], p["bh2"]))
    n = jnp.tanh(lin(x, p["wx3"], p["bx3"]) + r * lin(state, p["wh3"], p["bh3"]))
    return (1.0 - z) * n + z * state


def reference_gru_seq(xs, h0, p):
    def step(h, x):
        h_new = reference_gru(x, h, p)
        return h_new, h_new
    _, ys = jax.lax.scan(step, h0, xs)
    return ys


if __name__ == "__main__":
    batch = 16          # sharded 2-way across the parallel grid axis (bb = 8)
    input_size = 32
    hidden_size = 32
    seq_len = 16        # 2 time chunks of TBLK = 8

    key = jax.random.PRNGKey(0)
    k_x, k_h, k_p, k_seq = jax.random.split(key, 4)

    x = jax.random.normal(k_x, (batch, input_size), jnp.float32)
    state = jax.random.normal(k_h, (batch, hidden_size), jnp.float32)
    params = init_params(k_p, input_size, hidden_size)
    fused = pack_params(params, input_size, hidden_size)

    # --- single step (matches MyGRUv1Cell.forward) ---
    hdot = jax.block_until_ready(my_gru_v1_cell(x, state, fused))
    ref = reference_gru(x, state, params)
    assert hdot.shape == (batch, hidden_size)
    assert jnp.allclose(hdot, ref, atol=1e-3, rtol=1e-3)

    # --- sequence: time loop in-kernel, weights resident, batch sharded ---
    xs = jax.random.normal(k_seq, (seq_len, batch, input_size), jnp.float32)
    hs = jax.block_until_ready(
        my_gru_v1_sequence(xs, state, fused, tblk=8, batch_shards=2))
    ref_hs = reference_gru_seq(xs, state, params)
    assert hs.shape == (seq_len, batch, hidden_size)
    assert jnp.allclose(hs, ref_hs, atol=1e-3, rtol=1e-3)

    # --- bf16 weights (f32 accumulation + gate math), looser tolerance ---
    fused_bf16 = pack_params(params, input_size, hidden_size,
                             weight_dtype=jnp.bfloat16)
    hs_bf16 = jax.block_until_ready(
        my_gru_v1_sequence(xs, state, fused_bf16, tblk=8, batch_shards=2))
    assert jnp.allclose(hs_bf16, ref_hs, atol=5e-2, rtol=5e-2)

    print("KERNEL_OK")
</pallas_src>

<mosaic_0001>
module attributes {stable_mosaic.version = 11 : i64} {
  func.func @_gru_cell_kernel(%arg0: memref<16x128xf32, #tpu.memory_space<vmem>>, %arg1: memref<16x128xf32, #tpu.memory_space<vmem>>, %arg2: memref<256x512xf32, #tpu.memory_space<vmem>>, %arg3: memref<16x128xf32, #tpu.memory_space<vmem>>) attributes {dimension_semantics = [], scalar_prefetch = 0 : i64, scratch_operands = 0 : i64, tpu.core_type = #tpu.core_type<tc>} {
    %c0 = arith.constant 0 : index
    %c0_0 = arith.constant 0 : index
    %0 = vector.load %arg0[%c0, %c0_0] : memref<16x128xf32, #tpu.memory_space<vmem>>, vector<16x128xf32>
    %c0_1 = arith.constant 0 : index
    %c0_2 = arith.constant 0 : index
    %1 = vector.load %arg1[%c0_1, %c0_2] : memref<16x128xf32, #tpu.memory_space<vmem>>, vector<16x128xf32>
    %2 = tpu.concatenate %0, %1 in 1 : vector<16x128xf32>, vector<16x128xf32> -> vector<16x256xf32>
    %c0_3 = arith.constant 0 : index
    %c0_4 = arith.constant 0 : index
    %3 = vector.load %arg2[%c0_3, %c0_4] : memref<256x512xf32, #tpu.memory_space<vmem>>, vector<256x512xf32>
    %cst = arith.constant dense<0.000000e+00> : vector<16x512xf32>
    %4 = tpu.matmul %2, %3, %cst {dimension_numbers = #tpu.dot_dimension_numbers<[1], [0], [0], [1], [0, 0, 1, 1], [], []>} : vector<16x256xf32>, vector<256x512xf32>, vector<16x512xf32> -> vector<16x512xf32>
    %5 = vector.extract_strided_slice %4 {offsets = [0, 0], sizes = [16, 128], strides = [1, 1]} : vector<16x512xf32> to vector<16x128xf32>
    %cst_5 = arith.constant 5.000000e-01 : f32
    %6 = vector.broadcast %cst_5 : f32 to vector<16x128xf32>
    %7 = arith.mulf %6, %5 : vector<16x128xf32>
    %8 = math.tanh %7 : vector<16x128xf32>
    %cst_6 = arith.constant 1.000000e+00 : f32
    %9 = vector.broadcast %cst_6 : f32 to vector<16x128xf32>
    %10 = arith.addf %8, %9 : vector<16x128xf32>
    %cst_7 = arith.constant 5.000000e-01 : f32
    %11 = vector.broadcast %cst_7 : f32 to vector<16x128xf32>
    %12 = arith.mulf %11, %10 : vector<16x128xf32>
    %13 = vector.extract_strided_slice %4 {offsets = [0, 128], sizes = [16, 128], strides = [1, 1]} : vector<16x512xf32> to vector<16x128xf32>
    %cst_8 = arith.constant 5.000000e-01 : f32
    %14 = vector.broadcast %cst_8 : f32 to vector<16x128xf32>
    %15 = arith.mulf %14, %13 : vector<16x128xf32>
    %16 = math.tanh %15 : vector<16x128xf32>
    %cst_9 = arith.constant 1.000000e+00 : f32
    %17 = vector.broadcast %cst_9 : f32 to vector<16x128xf32>
    %18 = arith.addf %16, %17 : vector<16x128xf32>
    %cst_10 = arith.constant 5.000000e-01 : f32
    %19 = vector.broadcast %cst_10 : f32 to vector<16x128xf32>
    %20 = arith.mulf %19, %18 : vector<16x128xf32>
    %21 = vector.extract_strided_slice %4 {offsets = [0, 256], sizes = [16, 128], strides = [1, 1]} : vector<16x512xf32> to vector<16x128xf32>
    %22 = vector.extract_strided_slice %4 {offsets = [0, 384], sizes = [16, 128], strides = [1, 1]} : vector<16x512xf32> to vector<16x128xf32>
    %23 = arith.mulf %12, %22 : vector<16x128xf32>
    %24 = arith.addf %21, %23 : vector<16x128xf32>
    %25 = math.tanh %24 : vector<16x128xf32>
    %cst_11 = arith.constant 1.000000e+00 : f32
    %26 = vector.broadcast %cst_11 : f32 to vector<16x128xf32>
    %27 = arith.subf %26, %20 : vector<16x128xf32>
    %28 = arith.mulf %27, %25 : vector<16x128xf32>
    %29 = arith.mulf %20, %1 : vector<16x128xf32>
    %30 = arith.addf %28, %29 : vector<16x128xf32>
    %c0_12 = arith.constant 0 : index
    %c0_13 = arith.constant 0 : index
    %31 = vector.load %arg3[%c0_12, %c0_13] : memref<16x128xf32, #tpu.memory_space<vmem>>, vector<16x128xf32>
    tpu.vector_store %arg3[%c0_12, %c0_13], %30 {strides = array<i32>} : memref<16x128xf32, #tpu.memory_space<vmem>>, vector<16x128xf32>,
    return
  }
}

</mosaic_0001>

<bundles_post_ra>
// kernel: tpu_custom_call.1
= control target key start
LH: loop header
LB: loop body
LE: loop exit
PB: predicated region body
PF: predicated region fallthrough
CT: control target
= control target key end

     0   :  { %8 = vsyncpa [#allocation3], 0  ;;  %s586_s0 = inlined_call_operand.vmem [shape: f32[16,128], index: 0, kind: input, shape index: {}]   ;;  %s587_s1 = inlined_call_operand.hbm [shape: f32[16,128], index: 1, kind: input, shape index: {}, may-alias: {1,3}]   ;;  %s588_s2 = inlined_call_operand.hbm [shape: f32[256,512], index: 2, kind: input, shape index: {}]   ;;  %s589_s3 = inlined_call_operand.hbm [shape: f32[16,128], index: 3, kind: output, shape index: {}, may-alias: {1,3}]  }
   0x1   :  { %9 = vsyncpa [#allocation6], 0 }
   0x2   :  { %10 = vsyncpa [#allocation4], 0  ;;  %s17_s14 = sshll.u32 %s587_s1, 4  ;;  %s512_s15 = smov [#allocation2]   ;;  %s18_s14 = int_to_ptr.hbm [resolvable:$true] %s17_s14 }
   0x3   :  { %s19_s16 = sshll.u32 %s512_s15, 4  ;;  %s30_s19 = sshll.u32 %s588_s2, 4  ;;  %s20_s16 = int_to_ptr.vmem [resolvable:$true] %s19_s16  ;;  %s31_s19 = int_to_ptr.hbm [resolvable:$true] %s30_s19 }
   0x4   :  { %s513_s20 = smov 128   ;;  %s514_s21 = smov 8  }
   0x5   :  { %25 = dma.hbm_to_vmem [thread:$0]  %s18_s14, 256, %s20_s16, [#allocation3], %s513_s20, %s513_s20, %s514_s21  }
   0x6   :  { %s515_s22 = smov [#allocation5]   ;;  %s516_s24 = smov 512  }
   0x7   :  { %s32_s23 = sshll.u32 %s515_s22, 4  ;;  %s517_s1 = smov 32   ;;  %s33_s23 = int_to_ptr.vmem [resolvable:$true] %s32_s23 }
   0x8   :  { %38 = dma.hbm_to_vmem [thread:$0]  %s31_s19, 16384, %s33_s23, [#allocation6], %s516_s24, %s516_s24, %s517_s1  }
   0x9   :  { %506 = dma.done.wait [#allocation3], 256  }
   0xa   :  { %507 = vsyncadd [#allocation3], 4294967040 }
   0xb   :  { %508 = dma.done.wait [#allocation6], 16384  }
   0xc   :  { %509 = vsyncadd [#allocation6], 4294950912  ;;  %v112_v0 = vld [vmem:[#allocation5 + $0x1e8] sm:$0xff]  ;;  %v111_v6 = vld [vmem:[#allocation5 + $0x1e0] sm:$0xff]  ;;  %s401_s4 = sshll.u32 %s589_s3, 4  ;;  %s402_s4 = int_to_ptr.hbm [resolvable:$true] %s401_s4 }
   0xd   :  { %v176_v1 = vld [vmem:[#allocation5 + $0x3e8] sm:$0xff]  ;;  %225 = vmatpush.msra.mxu2 %v112_v0  ;;  %v175_v8 = vld [vmem:[#allocation5 + $0x3e0] sm:$0xff]  ;;  %179 = vmatpush.msra.mxu0 %v111_v6  ;;  %v114_v60 = vld [vmem:[#allocation5 + $0x1f8] sm:$0xff] }
   0xe   :  { %v108_v2 = vld [vmem:[#allocation5 + $0x1c8] sm:$0xff]  ;;  %248 = vmatpush.msra.mxu3 %v176_v1  ;;  %202 = vmatpush.msra.mxu1 %v175_v8  ;;  %v107_v10 = vld [vmem:[#allocation5 + $0x1c0] sm:$0xff]  ;;  %v178_v61 = vld [vmem:[#allocation5 + $0x3f8] sm:$0xff] }
   0xf   :  { %v172_v3 = vld [vmem:[#allocation5 + $0x3c8] sm:$0xff]  ;;  %226 = vmatpush.msra.mxu2 %v108_v2  ;;  %v171_v11 = vld [vmem:[#allocation5 + $0x3c0] sm:$0xff]  ;;  %180 = vmatpush.msra.mxu0 %v107_v10  ;;  %v110_v0 = vld [vmem:[#allocation5 + $0x1d8] sm:$0xff] }
  0x10   :  { %v104_v4 = vld [vmem:[#allocation5 + $0x1a8] sm:$0xff]  ;;  %249 = vmatpush.msra.mxu3 %v172_v3  ;;  %v103_v12 = vld [vmem:[#allocation5 + $0x1a0] sm:$0xff]  ;;  %203 = vmatpush.msra.mxu1 %v171_v11  ;;  %v174_v1 = vld [vmem:[#allocation5 + $0x3d8] sm:$0xff] }
  0x11   :  { %v168_v5 = vld [vmem:[#allocation5 + $0x3a8] sm:$0xff]  ;;  %227 = vmatpush.msra.mxu2 %v104_v4  ;;  %v167_v13 = vld [vmem:[#allocation5 + $0x3a0] sm:$0xff]  ;;  %181 = vmatpush.msra.mxu0 %v103_v12  ;;  %v106_v4 = vld [vmem:[#allocation5 + $0x1b8] sm:$0xff] }
  0x12   :  { %v100_v7 = vld [vmem:[#allocation5 + $0x188] sm:$0xff]  ;;  %250 = vmatpush.msra.mxu3 %v168_v5  ;;  %v99_v16 = vld [vmem:[#allocation5 + $0x180] sm:$0xff]  ;;  %204 = vmatpush.msra.mxu1 %v167_v13  ;;  %v170_v5 = vld [vmem:[#allocation5 + $0x3b8] sm:$0xff] }
  0x13   :  { %v164_v9 = vld [vmem:[#allocation5 + $0x388] sm:$0xff]  ;;  %228 = vmatpush.msra.mxu2 %v100_v7  ;;  %v163_v17 = vld [vmem:[#allocation5 + $0x380] sm:$0xff]  ;;  %182 = vmatpush.msra.mxu0 %v99_v16  ;;  %v113_v6 = vld [vmem:[#allocation5 + $0x1f0] sm:$0xff] }
  0x14   :  { %v96_v14 = vld [vmem:[#allocation5 + $0x168] sm:$0xff]  ;;  %251 = vmatpush.msra.mxu3 %v164_v9  ;;  %v95_v20 = vld [vmem:[#allocation5 + $0x160] sm:$0xff]  ;;  %205 = vmatpush.msra.mxu1 %v163_v17  ;;  %v177_v7 = vld [vmem:[#allocation5 + $0x3f0] sm:$0xff] }
  0x15   :  { %v160_v15 = vld [vmem:[#allocation5 + $0x368] sm:$0xff]  ;;  %229 = vmatpush.msra.mxu2 %v96_v14  ;;  %v159_v21 = vld [vmem:[#allocation5 + $0x360] sm:$0xff]  ;;  %183 = vmatpush.msra.mxu0 %v95_v20  ;;  %v102_v8 = vld [vmem:[#allocation5 + $0x198] sm:$0xff] }
  0x16   :  { %v92_v18 = vld [vmem:[#allocation5 + $0x148] sm:$0xff]  ;;  %252 = vmatpush.msra.mxu3 %v160_v15  ;;  %v91_v24 = vld [vmem:[#allocation5 + $0x140] sm:$0xff]  ;;  %206 = vmatpush.msra.mxu1 %v159_v21  ;;  %v166_v9 = vld [vmem:[#allocation5 + $0x398] sm:$0xff] }
  0x17   :  { %v156_v19 = vld [vmem:[#allocation5 + $0x348] sm:$0xff]  ;;  %230 = vmatpush.msra.mxu2 %v92_v18  ;;  %v155_v25 = vld [vmem:[#allocation5 + $0x340] sm:$0xff]  ;;  %184 = vmatpush.msra.mxu0 %v91_v24  ;;  %v109_v10 = vld [vmem:[#allocation5 + $0x1d0] sm:$0xff] }
  0x18   :  { %v88_v22 = vld [vmem:[#allocation5 + $0x128] sm:$0xff]  ;;  %253 = vmatpush.msra.mxu3 %v156_v19  ;;  %v87_v28 = vld [vmem:[#allocation5 + $0x120] sm:$0xff]  ;;  %207 = vmatpush.msra.mxu1 %v155_v25  ;;  %v173_v11 = vld [vmem:[#allocation5 + $0x3d0] sm:$0xff] }
  0x19   :  { %v152_v23 = vld [vmem:[#allocation5 + $0x328] sm:$0xff]  ;;  %231 = vmatpush.msra.mxu2 %v88_v22  ;;  %v151_v29 = vld [vmem:[#allocation5 + $0x320] sm:$0xff]  ;;  %185 = vmatpush.msra.mxu0 %v87_v28  ;;  %v98_v12 = vld [vmem:[#allocation5 + $0x178] sm:$0xff] }
  0x1a   :  { %v84_v26 = vld [vmem:[#allocation5 + $0x108] sm:$0xff]  ;;  %254 = vmatpush.msra.mxu3 %v152_v23  ;;  %v83_v32 = vld [vmem:[#allocation5 + $0x100] sm:$0xff]  ;;  %208 = vmatpush.msra.mxu1 %v151_v29  ;;  %v162_v13 = vld [vmem:[#allocation5 + $0x378] sm:$0xff] }
  0x1b   :  { %v148_v27 = vld [vmem:[#allocation5 + $0x308] sm:$0xff]  ;;  %232 = vmatpush.msra.mxu2 %v84_v26  ;;  %v147_v33 = vld [vmem:[#allocation5 + $0x300] sm:$0xff]  ;;  %186 = vmatpush.msra.mxu0 %v83_v32  ;;  %v105_v14 = vld [vmem:[#allocation5 + $0x1b0] sm:$0xff] }
  0x1c   :  { %v80_v30 = vld [vmem:[#allocation5 + $0xe8] sm:$0xff]  ;;  %255 = vmatpush.msra.mxu3 %v148_v27  ;;  %v79_v36 = vld [vmem:[#allocation5 + $0xe0] sm:$0xff]  ;;  %209 = vmatpush.msra.mxu1 %v147_v33  ;;  %v169_v15 = vld [vmem:[#allocation5 + $0x3b0] sm:$0xff] }
  0x1d   :  { %v144_v31 = vld [vmem:[#allocation5 + $0x2e8] sm:$0xff]  ;;  %233 = vmatpush.msra.mxu2 %v80_v30  ;;  %v143_v37 = vld [vmem:[#allocation5 + $0x2e0] sm:$0xff]  ;;  %187 = vmatpush.msra.mxu0 %v79_v36  ;;  %v94_v16 = vld [vmem:[#allocation5 + $0x158] sm:$0xff] }
  0x1e   :  { %v76_v34 = vld [vmem:[#allocation5 + $0xc8] sm:$0xff]  ;;  %256 = vmatpush.msra.mxu3 %v144_v31  ;;  %v75_v40 = vld [vmem:[#allocation5 + $0xc0] sm:$0xff]  ;;  %210 = vmatpush.msra.mxu1 %v143_v37  ;;  %v158_v17 = vld [vmem:[#allocation5 + $0x358] sm:$0xff] }
  0x1f   :  { %v140_v35 = vld [vmem:[#allocation5 + $0x2c8] sm:$0xff]  ;;  %234 = vmatpush.msra.mxu2 %v76_v34  ;;  %v139_v41 = vld [vmem:[#allocation5 + $0x2c0] sm:$0xff]  ;;  %188 = vmatpush.msra.mxu0 %v75_v40  ;;  %v101_v18 = vld [vmem:[#allocation5 + $0x190] sm:$0xff] }
  0x20   :  { %v72_v38 = vld [vmem:[#allocation5 + $0xa8] sm:$0xff]  ;;  %257 = vmatpush.msra.mxu3 %v140_v35  ;;  %v71_v44 = vld [vmem:[#allocation5 + $0xa0] sm:$0xff]  ;;  %211 = vmatpush.msra.mxu1 %v139_v41  ;;  %v165_v19 = vld [vmem:[#allocation5 + $0x390] sm:$0xff] }
  0x21   :  { %v136_v39 = vld [vmem:[#allocation5 + $0x2a8] sm:$0xff]  ;;  %235 = vmatpush.msra.mxu2 %v72_v38  ;;  %v135_v45 = vld [vmem:[#allocation5 + $0x2a0] sm:$0xff]  ;;  %189 = vmatpush.msra.mxu0 %v71_v44  ;;  %v90_v20 = vld [vmem:[#allocation5 + $0x138] sm:$0xff] }
  0x22   :  { %v68_v42 = vld [vmem:[#allocation5 + $0x88] sm:$0xff]  ;;  %258 = vmatpush.msra.mxu3 %v136_v39  ;;  %v67_v48 = vld [vmem:[#allocation5 + $0x80] sm:$0xff]  ;;  %212 = vmatpush.msra.mxu1 %v135_v45  ;;  %v154_v21 = vld [vmem:[#allocation5 + $0x338] sm:$0xff] }
  0x23   :  { %v132_v43 = vld [vmem:[#allocation5 + $0x288] sm:$0xff]  ;;  %236 = vmatpush.msra.mxu2 %v68_v42  ;;  %v131_v49 = vld [vmem:[#allocation5 + $0x280] sm:$0xff]  ;;  %190 = vmatpush.msra.mxu0 %v67_v48  ;;  %v551_v22 = vld [vmem:[%s586_s0] sm:$0xff] }
  0x24   :  { %v64_v46 = vld [vmem:[#allocation5 + $0x68] sm:$0xff]  ;;  %259 = vmatpush.msra.mxu3 %v132_v43  ;;  %v63_v52 = vld [vmem:[#allocation5 + $0x60] sm:$0xff]  ;;  %213 = vmatpush.msra.mxu1 %v131_v49  ;;  %v553_v23 = vld [vmem:[#allocation2] sm:$0xff] }
  0x25   :  { %v128_v47 = vld [vmem:[#allocation5 + $0x268] sm:$0xff]  ;;  %237 = vmatpush.msra.mxu2 %v64_v46  ;;  %v127_v53 = vld [vmem:[#allocation5 + $0x260] sm:$0xff]  ;;  %191 = vmatpush.msra.mxu0 %v63_v52  ;;  %v86_v24 = vld [vmem:[#allocation5 + $0x118] sm:$0xff] }
  0x26   :  { %v60_v50 = vld [vmem:[#allocation5 + $0x48] sm:$0xff]  ;;  %260 = vmatpush.msra.mxu3 %v128_v47  ;;  %v59_v56 = vld [vmem:[#allocation5 + $0x40] sm:$0xff]  ;;  %214 = vmatpush.msra.mxu1 %v127_v53  ;;  %v150_v25 = vld [vmem:[#allocation5 + $0x318] sm:$0xff] }
  0x27   :  { %v124_v51 = vld [vmem:[#allocation5 + $0x248] sm:$0xff]  ;;  %238 = vmatpush.msra.mxu2 %v60_v50  ;;  %v123_v57 = vld [vmem:[#allocation5 + $0x240] sm:$0xff]  ;;  %192 = vmatpush.msra.mxu0 %v59_v56  ;;  %v97_v26 = vld [vmem:[#allocation5 + $0x170] sm:$0xff] }
  0x28   :  { %v56_v54 = vld [vmem:[#allocation5 + $0x28] sm:$0xff]  ;;  %261 = vmatpush.msra.mxu3 %v124_v51  ;;  %215 = vmatpush.msra.mxu1 %v123_v57  ;;  %v55_v62 = vld [vmem:[#allocation5 + $0x20] sm:$0xff]  ;;  %v161_v27 = vld [vmem:[#allocation5 + $0x370] sm:$0xff] }
  0x29   :  { %v120_v55 = vld [vmem:[#allocation5 + $0x228] sm:$0xff]  ;;  %239 = vmatpush.msra.mxu2 %v56_v54  ;;  %v119_v63 = vld [vmem:[#allocation5 + $0x220] sm:$0xff]  ;;  %193 = vmatpush.msra.mxu0 %v55_v62  ;;  %v82_v28 = vld [vmem:[#allocation5 + $0xf8] sm:$0xff] }
  0x2a   :  { %v52_v58 = vld [vmem:[#allocation5 + $0x8] sm:$0xff]  ;;  %262 = vmatpush.msra.mxu3 %v120_v55  ;;  %v51_v2 = vld [vmem:[#allocation5] sm:$0xff]  ;;  %216 = vmatpush.msra.mxu1 %v119_v63  ;;  %v146_v29 = vld [vmem:[#allocation5 + $0x2f8] sm:$0xff] }
  0x2b   :  { %v116_v59 = vld [vmem:[#allocation5 + $0x208] sm:$0xff]  ;;  %240 = vmatpush.msra.mxu2 %v52_v58  ;;  %v115_v3 = vld [vmem:[#allocation5 + $0x200] sm:$0xff]  ;;  %194 = vmatpush.msra.mxu0 %v51_v2  ;;  %v93_v30 = vld [vmem:[#allocation5 + $0x150] sm:$0xff] }
  0x2c   :  { %263 = vmatpush.msra.mxu3 %v116_v59  ;;  %217 = vmatpush.msra.mxu1 %v115_v3  ;;  %v157_v31 = vld [vmem:[#allocation5 + $0x350] sm:$0xff]  ;;  %v78_v32 = vld [vmem:[#allocation5 + $0xd8] sm:$0xff] }
  0x2d   :  { %317 = vmatpush.msrb.mxu2 %v114_v60  ;;  %271 = vmatpush.msrb.mxu0 %v113_v6  ;;  %v142_v33 = vld [vmem:[#allocation5 + $0x2d8] sm:$0xff]  ;;  %v89_v34 = vld [vmem:[#allocation5 + $0x130] sm:$0xff] }
  0x2e   :  { %340 = vmatpush.msrb.mxu3 %v178_v61  ;;  %294 = vmatpush.msrb.mxu1 %v177_v7  ;;  %v153_v35 = vld [vmem:[#allocation5 + $0x330] sm:$0xff]  ;;  %v74_v36 = vld [vmem:[#allocation5 + $0xb8] sm:$0xff] }
  0x2f   :  { %318 = vmatpush.msrb.mxu2 %v110_v0  ;;  %272 = vmatpush.msrb.mxu0 %v109_v10  ;;  %v138_v37 = vld [vmem:[#allocation5 + $0x2b8] sm:$0xff]  ;;  %v85_v38 = vld [vmem:[#allocation5 + $0x110] sm:$0xff] }
  0x30   :  { %341 = vmatpush.msrb.mxu3 %v174_v1  ;;  %295 = vmatpush.msrb.mxu1 %v173_v11  ;;  %v149_v39 = vld [vmem:[#allocation5 + $0x310] sm:$0xff]  ;;  %v70_v40 = vld [vmem:[#allocation5 + $0x98] sm:$0xff] }
  0x31   :  { %319 = vmatpush.msrb.mxu2 %v106_v4  ;;  %273 = vmatpush.msrb.mxu0 %v105_v14  ;;  %v134_v41 = vld [vmem:[#allocation5 + $0x298] sm:$0xff]  ;;  %v81_v44 = vld [vmem:[#allocation5 + $0xf0] sm:$0xff] }
  0x32   :  { %342 = vmatpush.msrb.mxu3 %v170_v5  ;;  %296 = vmatpush.msrb.mxu1 %v169_v15  ;;  %v560_v42 = vld [vmem:[%s586_s0 + $0x8] sm:$0xff]  ;;  %v145_v45 = vld [vmem:[#allocation5 + $0x2f0] sm:$0xff]  ;;  %s518_s0 = smov [#allocation7]  }
  0x33   :  { %320 = vmatpush.msrb.mxu2 %v102_v8  ;;  %274 = vmatpush.msrb.mxu0 %v101_v18  ;;  %v562_v43 = vld [vmem:[#allocation2 + $0x8] sm:$0xff]  ;;  %v77_v48 = vld [vmem:[#allocation5 + $0xd0] sm:$0xff]  ;;  %s399_s28 = sshll.u32 %s518_s0, 4  ;;  %s400_s28 = int_to_ptr.vmem [resolvable:$true] %s399_s28 }
  0x34   :  { %343 = vmatpush.msrb.mxu3 %v166_v9  ;;  %297 = vmatpush.msrb.mxu1 %v165_v19  ;;  %v66_v46 = vld [vmem:[#allocation5 + $0x78] sm:$0xff]  ;;  %v141_v49 = vld [vmem:[#allocation5 + $0x2d0] sm:$0xff] }
  0x35   :  { %321 = vmatpush.msrb.mxu2 %v98_v12  ;;  %264 = vmatmul.f32.vlgmr.msra.gmra.mxu3 %v553_v23  ;;  %v130_v47 = vld [vmem:[#allocation5 + $0x278] sm:$0xff]  ;;  %v73_v52 = vld [vmem:[#allocation5 + $0xb0] sm:$0xff] }
  0x36   :  { %344 = vmatpush.msrb.mxu3 %v162_v13  ;;  %241 = vmatmul.f32.vlgmr.msra.gmra.mxu2 %v551_v22  ;;  %v62_v50 = vld [vmem:[#allocation5 + $0x58] sm:$0xff]  ;;  %v137_v53 = vld [vmem:[#allocation5 + $0x2b0] sm:$0xff] }
  0x37   :  { %322 = vmatpush.msrb.mxu2 %v94_v16  ;;  %275 = vmatpush.msrb.mxu0 %v97_v26  ;;  %v126_v51 = vld [vmem:[#allocation5 + $0x258] sm:$0xff]  ;;  %v69_v56 = vld [vmem:[#allocation5 + $0x90] sm:$0xff] }
  0x38   :  { %345 = vmatpush.msrb.mxu3 %v158_v17  ;;  %298 = vmatpush.msrb.mxu1 %v161_v27  ;;  %v58_v54 = vld [vmem:[#allocation5 + $0x38] sm:$0xff]  ;;  %v133_v57 = vld [vmem:[#allocation5 + $0x290] sm:$0xff] }
  0x39   :  { %323 = vmatpush.msrb.mxu2 %v90_v20  ;;  %276 = vmatpush.msrb.mxu0 %v93_v30  ;;  %v122_v55 = vld [vmem:[#allocation5 + $0x238] sm:$0xff]  ;;  %v65_v60 = vld [vmem:[#allocation5 + $0x70] sm:$0xff] }
  0x3a   :  { %346 = vmatpush.msrb.mxu3 %v154_v21  ;;  %299 = vmatpush.msrb.mxu1 %v157_v31  ;;  %v54_v58 = vld [vmem:[#allocation5 + $0x18] sm:$0xff]  ;;  %v129_v61 = vld [vmem:[#allocation5 + $0x270] sm:$0xff] }
  0x3b   :  { %324 = vmatpush.msrb.mxu2 %v86_v24  ;;  %277 = vmatpush.msrb.mxu0 %v89_v34  ;;  %v118_v59 = vld [vmem:[#allocation5 + $0x218] sm:$0xff]  ;;  %v61_v62 = vld [vmem:[#allocation5 + $0x50] sm:$0xff] }
  0x3c   :  { %347 = vmatpush.msrb.mxu3 %v150_v25  ;;  %300 = vmatpush.msrb.mxu1 %v153_v35  ;;  %v125_v63 = vld [vmem:[#allocation5 + $0x250] sm:$0xff] }
  0x3d   :  { %325 = vmatpush.msrb.mxu2 %v82_v28  ;;  %278 = vmatpush.msrb.mxu0 %v85_v38  ;;  %v57_v0 = vld [vmem:[#allocation5 + $0x30] sm:$0xff] }
  0x3e   :  { %348 = vmatpush.msrb.mxu3 %v146_v29  ;;  %301 = vmatpush.msrb.mxu1 %v149_v39  ;;  %v121_v1 = vld [vmem:[#allocation5 + $0x230] sm:$0xff] }
  0x3f   :  { %326 = vmatpush.msrb.mxu2 %v78_v32  ;;  %195 = vmatmul.f32.vlgmr.msra.gmra.mxu0 %v551_v22  ;;  %v53_v2 = vld [vmem:[#allocation5 + $0x10] sm:$0xff] }
  0x40   :  { %349 = vmatpush.msrb.mxu3 %v142_v33  ;;  %218 = vmatmul.f32.vlgmr.msra.gmra.mxu1 %v553_v23  ;;  %v117_v3 = vld [vmem:[#allocation5 + $0x210] sm:$0xff] }
  0x41   :  { %327 = vmatpush.msrb.mxu2 %v74_v36  ;;  %267 = vmatmul.f32.gmra.mxu3 %v562_v43 }
  0x42   :  { %350 = vmatpush.msrb.mxu3 %v138_v37  ;;  %244 = vmatmul.f32.gmra.mxu2 %v560_v42 }
  0x43   :  { %328 = vmatpush.msrb.mxu2 %v70_v40  ;;  %279 = vmatpush.msrb.mxu0 %v81_v44 }
  0x44   :  { %351 = vmatpush.msrb.mxu3 %v134_v41  ;;  %302 = vmatpush.msrb.mxu1 %v145_v45 }
  0x45   :  { %329 = vmatpush.msrb.mxu2 %v66_v46  ;;  %280 = vmatpush.msrb.mxu0 %v77_v48 }
  0x46   :  { %352 = vmatpush.msrb.mxu3 %v130_v47  ;;  %303 = vmatpush.msrb.mxu1 %v141_v49 }
  0x47   :  { %330 = vmatpush.msrb.mxu2 %v62_v50  ;;  %281 = vmatpush.msrb.mxu0 %v73_v52 }
  0x48   :  { %353 = vmatpush.msrb.mxu3 %v126_v51  ;;  %304 = vmatpush.msrb.mxu1 %v137_v53 }
  0x49   :  { %331 = vmatpush.msrb.mxu2 %v58_v54  ;;  %282 = vmatpush.msrb.mxu0 %v69_v56 }
  0x4a   :  { %354 = vmatpush.msrb.mxu3 %v122_v55  ;;  %305 = vmatpush.msrb.mxu1 %v133_v57 }
  0x4b   :  { %332 = vmatpush.msrb.mxu2 %v54_v58  ;;  %198 = vmatmul.f32.gmra.mxu0 %v560_v42 }
  0x4c   :  { %355 = vmatpush.msrb.mxu3 %v118_v59  ;;  %221 = vmatmul.f32.gmra.mxu1 %v562_v43 }
  0x4d   :  { %333 = vmatmul.f32.vlgmr.msrb.gmra.mxu2 %v551_v22  ;;  %356 = vmatmul.f32.vlgmr.msrb.gmra.mxu3 %v553_v23 }
  0x4e   :  { %283 = vmatpush.msrb.mxu0 %v65_v60  ;;  %306 = vmatpush.msrb.mxu1 %v129_v61 }
  0x50   :  { %284 = vmatpush.msrb.mxu0 %v61_v62  ;;  %307 = vmatpush.msrb.mxu1 %v125_v63 }
  0x52   :  { %285 = vmatpush.msrb.mxu0 %v57_v0  ;;  %308 = vmatpush.msrb.mxu1 %v121_v1 }
  0x54   :  { %286 = vmatpush.msrb.mxu0 %v53_v2  ;;  %309 = vmatpush.msrb.mxu1 %v117_v3 }
  0x55   :  { %287 = vmatmul.f32.vlgmr.msrb.gmra.mxu0 %v551_v22  ;;  %310 = vmatmul.f32.vlgmr.msrb.gmra.mxu1 %v553_v23 }
  0x56   :  { %336 = vmatmul.f32.gmra.mxu2 %v560_v42  ;;  %359 = vmatmul.f32.gmra.mxu3 %v562_v43 }
  0x5d   :  { %290 = vmatmul.f32.gmra.mxu0 %v560_v42  ;;  %313 = vmatmul.f32.gmra.mxu1 %v562_v43 }
  0xb8   :  { %v265_v5 = vpop.f32.mrf.mxu3 }
  0xb9   :  { %v242_v4 = vpop.f32.mrf.mxu2 }
  0xba   :  { %v266_v10 = vadd.f32 %v265_v5, %v242_v4 }
  0xbc   :  { %v196_v6 = vpop.f32.mrf.mxu0  ;;  %v371_v13 = vmul.f32 0.5, %v266_v10 }
  0xbd   :  { %v219_v7 = vpop.f32.mrf.mxu1 }
  0xbe   :  { %v220_v8 = vadd.f32 %v219_v7, %v196_v6 }
  0xc0   :  { %v363_v9 = vmul.f32 0.5, %v220_v8 }
  0xc2   :  { %422 = vtanh.f32 %v363_v9 }
  0xc3   :  { %424 = vtanh.f32 %v371_v13 }
  0xc4   :  { %v268_v12 = vpop.f32.mrf.mxu3 }
  0xc5   :  { %v245_v11 = vpop.f32.mrf.mxu2 }
  0xc6   :  { %v269_v19 = vadd.f32 %v268_v12, %v245_v11 }
  0xc8   :  { %v199_v14 = vpop.f32.mrf.mxu0  ;;  %v423_v16 = vpop.eup %422  ;;  %v372_v22 = vmul.f32 0.5, %v269_v19 }
  0xc9   :  { %v222_v15 = vpop.f32.mrf.mxu1  ;;  %v367_v18 = vadd.f32 1.0, %v423_v16  ;;  %v425_v26 = vpop.eup %424 }
  0xca   :  { %v223_v17 = vadd.f32 %v222_v15, %v199_v14  ;;  %v375_v33 = vadd.f32 1.0, %v425_v26 }
  0xcb   :  { %v369_v21 = vmul.f32 0.5, %v367_v18 }
  0xcc   :  { %v364_v20 = vmul.f32 0.5, %v223_v17  ;;  %v377_v36 = vmul.f32 0.5, %v375_v33 }
  0xce   :  { %426 = vtanh.f32 %v364_v20  ;;  %v385_v46 = vsub.f32 1.0, %v377_v36  ;;  %v389_v50 = vmul.f32 %v377_v36, %v553_v23 }
  0xcf   :  { %428 = vtanh.f32 %v372_v22 }
  0xd0   :  { %v334_v24 = vpop.f32.mrf.mxu2  ;;  %v357_v25 = vpop.f32.mrf.mxu3 }
  0xd1   :  { %v358_v27 = vadd.f32 %v357_v25, %v334_v24 }
  0xd2   :  { %v288_v28 = vpop.f32.mrf.mxu0  ;;  %v311_v29 = vpop.f32.mrf.mxu1 }
  0xd3   :  { %v379_v30 = vmul.f32 %v369_v21, %v358_v27  ;;  %v312_v31 = vadd.f32 %v311_v29, %v288_v28 }
  0xd4   :  { %v427_v32 = vpop.eup %426 }
  0xd5   :  { %v368_v34 = vadd.f32 1.0, %v427_v32  ;;  %v381_v35 = vadd.f32 %v379_v30, %v312_v31  ;;  %v429_v40 = vpop.eup %428 }
  0xd6   :  { %v376_v49 = vadd.f32 1.0, %v429_v40 }
  0xd7   :  { %430 = vtanh.f32 %v381_v35  ;;  %v370_v37 = vmul.f32 0.5, %v368_v34 }
  0xd8   :  { %v378_v54 = vmul.f32 0.5, %v376_v49 }
  0xd9   :  { %v337_v38 = vpop.f32.mrf.mxu2  ;;  %v360_v39 = vpop.f32.mrf.mxu3 }
  0xda   :  { %v361_v41 = vadd.f32 %v360_v39, %v337_v38  ;;  %v291_v42 = vpop.f32.mrf.mxu0  ;;  %v314_v44 = vpop.f32.mrf.mxu1  ;;  %v386_v55 = vsub.f32 1.0, %v378_v54  ;;  %v390_v57 = vmul.f32 %v378_v54, %v562_v43 }
  0xdb   :  { %v315_v45 = vadd.f32 %v314_v44, %v291_v42 }
  0xdc   :  { %v380_v47 = vmul.f32 %v370_v37, %v361_v41 }
  0xdd   :  { %v431_v48 = vpop.eup %430 }
  0xde   :  { %v382_v51 = vadd.f32 %v380_v47, %v315_v45  ;;  %v387_v52 = vmul.f32 %v431_v48, %v385_v46 }
  0xe0   :  { %432 = vtanh.f32 %v382_v51  ;;  %v391_v53 = vadd.f32 %v389_v50, %v387_v52 }
  0xe2   :  { %393 = vst [vmem:[#allocation7] sm:$0xff] %v391_v53 }
  0xe6   :  { %v433_v56 = vpop.eup %432 }
  0xe7   :  { %v388_v58 = vmul.f32 %v433_v56, %v386_v55 }
  0xe9   :  { %v392_v59 = vadd.f32 %v390_v57, %v388_v58 }
  0xeb   :  { %394 = vst [vmem:[#allocation7 + $0x8] sm:$0xff] %v392_v59 }
  0xec   :  { %407 = dma.vmem_to_hbm [thread:$0]  %s400_s28, 256, %s402_s4, [#allocation4], %s513_s20, %s513_s20, %s514_s21  }
  0xed   :  { %510 = dma.done.wait [#allocation4], 256  }
  0xee   :  { %511 = vsyncadd [#allocation4], 4294967040 }
  0xef   :  { %412 = vsyncpa [#allocation3], 1 }
  0xf0   :  { %413 = vsyncpa [#allocation6], 1 }
  0xf1   :  { %414 = vsyncpa [#allocation4], 1 }

</bundles_post_ra>
